<compile_context>
chip_gen: v7x
topology: tpu7x:2x2x1
jax: 0.10.0
libtpu: 0.0.40
codegen_flags: <defaults>
</compile_context>

<pallas_src>
import functools
import math

import jax
import jax.numpy as jnp
from jax.experimental import pallas as pl
from jax.experimental.pallas import tpu as pltpu


# ---------------------------------------------------------------------------
# Kernels
# ---------------------------------------------------------------------------
def _xw_kernel(x_ref, w_ref, o_ref):
    """support tile = x_tile @ weight (MXU matmul, f32 accumulation)."""
    o_ref[...] = jnp.dot(
        x_ref[...], w_ref[...], preferred_element_type=jnp.float32
    ).astype(o_ref.dtype)


def _adj_support_bias_kernel(nz_ref, col_ref, adj_ref, s_ref, b_ref, o_ref,
                             acc_ref, *, tk, support_resident):
    """out tile = adj_tile @ support (+ bias), accumulated over the k axis.

    nz_ref/col_ref are scalar-prefetched SMEM maps: nz[i,k] says whether the
    (i,k) adj block has any nonzero; col[i,k] is the column-block actually
    fetched (zero blocks are remapped to the last nonzero block so Pallas
    skips the DMA, and the dot is skipped with pl.when).
    """
    i = pl.program_id(0)
    k = pl.program_id(1)

    @pl.when(k == 0)
    def _():
        acc_ref[...] = jnp.zeros_like(acc_ref)

    @pl.when(nz_ref[i, k] != 0)
    def _():
        if support_resident:
            off = pl.multiple_of(k * tk, tk)
            s = s_ref[pl.ds(off, tk), :]
        else:
            s = s_ref[...]
        acc_ref[...] += jnp.dot(adj_ref[...], s,
                                preferred_element_type=jnp.float32)

    @pl.when(k == pl.num_programs(1) - 1)
    def _():
        # Bias add / epilogue kept in f32 (v5e VPU has no bf16 path).
        o_ref[...] = (acc_ref[...] + b_ref[...]).astype(o_ref.dtype)


# ---------------------------------------------------------------------------
# Tile / capacity helpers
# ---------------------------------------------------------------------------
def _round_up(x, m):
    return ((x + m - 1) // m) * m


def _vmem_capacity_bytes():
    """Per-TensorCore VMEM capacity with a device_kind fallback."""
    kind = ""
    try:
        kind = jax.devices()[0].device_kind.lower()
    except Exception:
        pass
    cap = 0
    try:
        info = pltpu.get_tpu_info()
        cap = int(getattr(info, "vmem_capacity_bytes", 0) or 0)
    except Exception:
        cap = 0
    if "v7" in kind:
        # v7x has 64 MiB per TensorCore; clamp in case the query reports
        # chip-level capacity while the row grid is sharded across both cores.
        return min(cap or (64 << 20), 64 << 20)
    if cap:
        return cap
    if ("v5" in kind) or ("v6" in kind):
        return 128 << 20
    return 64 << 20  # conservative default for unknown parts


def _select_tiles(n, f_pad, elt, budget, tm=None, tk=None):
    """Pick (tm, tk, support_resident, n_pad) within the stage-2 VMEM budget.

    Tiles are multiples of 128; preference is (1) minimal zero-padding of the
    N^2 adj stream, then (2) the largest tile area / row tile that fits.
    """
    n128 = _round_up(n, 128)
    cap_tile = max(128, min(n128, 2048))
    cands = sorted({c for c in (2048, 1024, 512, 256, 128, n128)
                    if 128 <= c <= cap_tile}, reverse=True)
    tm_c = [max(128, _round_up(int(tm), 128))] if tm is not None else cands
    tk_c = [max(128, _round_up(int(tk), 128))] if tk is not None else cands

    best = None
    for tmc in tm_c:
        for tkc in tk_c:
            n_pad = _round_up(n, math.lcm(tmc, tkc))
            res_bytes = 2 * n_pad * f_pad * elt           # resident support (2 bufs, conservative)
            resident = res_bytes <= budget // 2
            footprint = (2 * tmc * tkc * elt               # adj, double-buffered
                         + 2 * tmc * f_pad * 4             # out, double-buffered (f32)
                         + tmc * f_pad * 4                 # f32 accumulator scratch
                         + 2 * 8 * f_pad * 4)              # bias (layout-padded)
            footprint += res_bytes if resident else 2 * tkc * f_pad * elt
            if footprint > budget:
                continue
            key = (n_pad, -(tmc * tkc), -tmc)
            if best is None or key < best[0]:
                best = (key, tmc, tkc, resident, n_pad)
    if best is None:
        return 128, 128, False, _round_up(n, 128)
    return best[1], best[2], best[3], best[4]


# ---------------------------------------------------------------------------
# Public wrapper
# ---------------------------------------------------------------------------
def graph_convolution(x, adj, weight, bias=None, *, compute_dtype=jnp.bfloat16,
                      block_sparse=True, tm=None, tk=None):
    """Pallas GCN forward: adj @ (x @ weight) [+ bias].

    x:      [N, F_in]   float32
    adj:    [N, N]      dense adjacency (torch.spmm on dense adj == matmul)
    weight: [F_in, F_out]
    bias:   [F_out] or None
    compute_dtype: streaming dtype for adj/x/weight/support (bf16 default —
                   stage 2 is HBM-bound; accumulation stays f32). Use
                   jnp.float32 for exact results.
    block_sparse:  skip all-zero adj blocks via scalar-prefetched maps.
    tm, tk: optional tile-size overrides (adj row tile / contraction tile).
    returns [N, F_out] float32
    """
    N, F_in = x.shape
    F_out = weight.shape[1]
    F_pad = _round_up(F_out, 128)            # lane-dense output stores
    elt = jnp.dtype(compute_dtype).itemsize

    vmem_cap = _vmem_capacity_bytes()
    vmem_limit = max(32 << 20, vmem_cap - (4 << 20))   # 4 MiB Mosaic headroom
    budget = int(vmem_cap * 0.55)                      # tile-selection budget

    tm, tk, sup_resident, N_pad = _select_tiles(N, F_pad, elt, budget, tm=tm, tk=tk)

    # ---- zero-pad operands to tile granularity (numerically exact) ----------
    x_c = x.astype(compute_dtype)
    if N_pad != N:
        x_c = jnp.pad(x_c, ((0, N_pad - N), (0, 0)))
    w_c = weight.astype(compute_dtype)
    if F_pad != F_out:
        w_c = jnp.pad(w_c, ((0, 0), (0, F_pad - F_out)))
    adj_c = adj.astype(compute_dtype)
    if N_pad != N:
        adj_c = jnp.pad(adj_c, ((0, N_pad - N), (0, N_pad - N)))
    if bias is None:
        bias_p = jnp.zeros((1, F_pad), jnp.float32)
    else:
        bias_p = jnp.pad(bias.astype(jnp.float32).reshape(1, F_out),
                         ((0, 0), (0, F_pad - F_out)))

    nbi, nbk = N_pad // tm, N_pad // tk

    # ---- block-sparsity maps (scalar-prefetched into SMEM) ------------------
    if block_sparse:
        blocks = adj_c.reshape(nbi, tm, nbk, tk)
        nz = jnp.any(blocks != 0, axis=(1, 3))
    else:
        nz = jnp.ones((nbi, nbk), dtype=bool)
    nz_i32 = nz.astype(jnp.int32)
    k_idx = jnp.broadcast_to(jnp.arange(nbk, dtype=jnp.int32)[None, :], (nbi, nbk))
    # col[i,k] = last nonzero k-block index <= k (DMA-skip remap for zero blocks)
    col_map = jax.lax.cummax(jnp.where(nz, k_idx, 0), axis=1).astype(jnp.int32)
    # TODO(synk): flatten nz/col to 1-D for very large graphs to avoid SMEM 2-D padding.

    # ---- Stage 1: support = x @ weight (computed once, row-tiled) -----------
    tm1 = min(tm, 512)
    if N_pad % tm1 != 0:
        tm1 = tm
    support = pl.pallas_call(
        _xw_kernel,
        out_shape=jax.ShapeDtypeStruct((N_pad, F_pad), compute_dtype),
        grid_spec=pltpu.PrefetchScalarGridSpec(
            num_scalar_prefetch=0,
            grid=(N_pad // tm1,),
            in_specs=[
                pl.BlockSpec((tm1, F_in), lambda i: (i, 0)),
                pl.BlockSpec((F_in, F_pad), lambda i: (0, 0)),
            ],
            out_specs=pl.BlockSpec((tm1, F_pad), lambda i: (i, 0)),
        ),
        compiler_params=pltpu.CompilerParams(
            dimension_semantics=("parallel",),
            vmem_limit_bytes=vmem_limit,
        ),
        cost_estimate=pl.CostEstimate(
            flops=2 * N_pad * F_in * F_pad,
            transcendentals=0,
            bytes_accessed=elt * (N_pad * F_in + F_in * F_pad + N_pad * F_pad),
        ),
    )(x_c, w_c)

    # ---- Stage 2: out = adj @ support + bias (rows x contraction grid) ------
    if sup_resident:
        # Whole support slab stays resident in VMEM; sliced in-kernel by k.
        s_spec = pl.BlockSpec((N_pad, F_pad), lambda i, k, nz, col: (0, 0))
        sup_read_bytes = N_pad * F_pad * elt
    else:
        s_spec = pl.BlockSpec((tk, F_pad), lambda i, k, nz, col: (col[i, k], 0))
        sup_read_bytes = nbi * N_pad * F_pad * elt

    kernel = functools.partial(_adj_support_bias_kernel, tk=tk,
                               support_resident=sup_resident)

    out_padded = pl.pallas_call(
        kernel,
        out_shape=jax.ShapeDtypeStruct((N_pad, F_pad), jnp.float32),
        grid_spec=pltpu.PrefetchScalarGridSpec(
            num_scalar_prefetch=2,
            grid=(nbi, nbk),
            in_specs=[
                pl.BlockSpec((tm, tk), lambda i, k, nz, col: (i, col[i, k])),
                s_spec,
                pl.BlockSpec((1, F_pad), lambda i, k, nz, col: (0, 0)),
            ],
            out_specs=pl.BlockSpec((tm, F_pad), lambda i, k, nz, col: (i, 0)),
            scratch_shapes=[pltpu.VMEM((tm, F_pad), jnp.float32)],
        ),
        compiler_params=pltpu.CompilerParams(
            dimension_semantics=("parallel", "arbitrary"),
            vmem_limit_bytes=vmem_limit,
        ),
        cost_estimate=pl.CostEstimate(
            flops=2 * N_pad * N_pad * F_pad,
            transcendentals=0,
            bytes_accessed=(elt * N_pad * N_pad + sup_read_bytes
                            + 4 * F_pad + 4 * N_pad * F_pad),
        ),
    )(nz_i32, col_map, adj_c, support, bias_p)

    if (N_pad, F_pad) != (N, F_out):
        return out_padded[:N, :F_out]
    return out_padded


def init_gcn_params(key, in_features, out_features, bias=True):
    """Deterministic init mirroring GraphConvolution.reset_parameters()."""
    stdv = 1.0 / math.sqrt(out_features)
    kw, kb = jax.random.split(key)
    weight = jax.random.uniform(
        kw, (in_features, out_features), jnp.float32, minval=-stdv, maxval=stdv
    )
    b = (
        jax.random.uniform(kb, (out_features,), jnp.float32, minval=-stdv, maxval=stdv)
        if bias
        else None
    )
    return weight, b


if __name__ == "__main__":
    # Small, GCN-like shapes: N nodes, in_features -> out_features.
    N, F_IN, F_OUT = 256, 64, 32

    key = jax.random.PRNGKey(0)
    k_x, k_adj, k_param = jax.random.split(key, 3)

    x = jax.random.normal(k_x, (N, F_IN), dtype=jnp.float32)

    # Symmetric, row-normalized dense adjacency (typical GCN A~).
    raw = (jax.random.uniform(k_adj, (N, N)) < 0.08).astype(jnp.float32)
    adj = raw + raw.T + jnp.eye(N, dtype=jnp.float32)
    adj = jnp.minimum(adj, 1.0)
    adj = adj / jnp.sum(adj, axis=1, keepdims=True)

    weight, bias = init_gcn_params(k_param, F_IN, F_OUT, bias=True)

    # Plain-JAX references (same semantics as the torch module).
    ref = adj @ (x @ weight) + bias[None, :]
    ref_nb = adj @ (x @ weight)

    # 1) Default path: bf16 streaming, f32 accumulation (bandwidth-optimal).
    out = jax.block_until_ready(graph_convolution(x, adj, weight, bias))
    assert out.shape == (N, F_OUT)
    assert jnp.allclose(out, ref, atol=5e-2, rtol=5e-2), "bf16 mismatch vs reference"

    # 2) Exact f32 path (auto tile selection -> single-tile, resident support).
    out_f32 = jax.block_until_ready(
        graph_convolution(x, adj, weight, bias, compute_dtype=jnp.float32)
    )
    assert jnp.allclose(out_f32, ref, atol=2e-3, rtol=2e-3), "f32 mismatch vs reference"

    # 3) Forced multi-tile grid (2x2) + no-bias path.
    out_nb = jax.block_until_ready(
        graph_convolution(x, adj, weight, None, compute_dtype=jnp.float32,
                          tm=128, tk=128)
    )
    assert jnp.allclose(out_nb, ref_nb, atol=2e-3, rtol=2e-3), "tiled/no-bias mismatch"

    # 4) N not a multiple of 128: exercises the exact zero-padding path.
    N2 = 200
    x2 = x[:N2]
    adj2 = adj[:N2, :N2]
    adj2 = adj2 / jnp.sum(adj2, axis=1, keepdims=True)
    ref2 = adj2 @ (x2 @ weight) + bias[None, :]
    out2 = jax.block_until_ready(
        graph_convolution(x2, adj2, weight, bias, compute_dtype=jnp.float32)
    )
    assert out2.shape == (N2, F_OUT)
    assert jnp.allclose(out2, ref2, atol=2e-3, rtol=2e-3), "padded-N mismatch"

    # 5) Block-diagonal adjacency: exercises the block-sparse DMA/compute skip.
    blk = 128
    mask = jnp.kron(jnp.eye(N // blk, dtype=jnp.float32),
                    jnp.ones((blk, blk), jnp.float32))
    adj_bs = adj * mask
    adj_bs = adj_bs / jnp.sum(adj_bs, axis=1, keepdims=True)
    ref_bs = adj_bs @ (x @ weight) + bias[None, :]
    out_bs = jax.block_until_ready(
        graph_convolution(x, adj_bs, weight, bias, compute_dtype=jnp.float32,
                          tm=128, tk=128)
    )
    assert jnp.allclose(out_bs, ref_bs, atol=2e-3, rtol=2e-3), "block-sparse mismatch"

    print("KERNEL_OK")
</pallas_src>

<mosaic_0001>
module attributes {stable_mosaic.version = 11 : i64} {
  func.func @_xw_kernel(%arg0: i32, %arg1: memref<256x64xbf16, #tpu.memory_space<vmem>>, %arg2: memref<64x128xbf16, #tpu.memory_space<vmem>>, %arg3: memref<256x128xbf16, #tpu.memory_space<vmem>>) attributes {dimension_semantics = [#tpu.dimension_semantics<parallel>], iteration_bounds = array<i64: 1>, scalar_prefetch = 0 : i64, scratch_operands = 0 : i64, tpu.core_type = #tpu.core_type<tc>, window_params = [{transform_indices = @transform_0, window_bounds = array<i64: 256, 64>}, {pipeline_mode = #tpu.pipeline_mode<synchronous>, transform_indices = @transform_1, window_bounds = array<i64: 64, 128>}, {transform_indices = @transform_2, window_bounds = array<i64: 256, 128>}]} {
    %c0 = arith.constant 0 : index
    %c0_0 = arith.constant 0 : index
    %0 = vector.load %arg1[%c0, %c0_0] : memref<256x64xbf16, #tpu.memory_space<vmem>>, vector<256x64xbf16>
    %c0_1 = arith.constant 0 : index
    %c0_2 = arith.constant 0 : index
    %1 = vector.load %arg2[%c0_1, %c0_2] : memref<64x128xbf16, #tpu.memory_space<vmem>>, vector<64x128xbf16>
    %cst = arith.constant dense<0.000000e+00> : vector<256x128xf32>
    %2 = tpu.matmul %0, %1, %cst {dimension_numbers = #tpu.dot_dimension_numbers<[1], [0], [0], [1], [0, 0, 1, 1], [], []>} : vector<256x64xbf16>, vector<64x128xbf16>, vector<256x128xf32> -> vector<256x128xf32>
    %3 = arith.truncf %2 : vector<256x128xf32> to vector<256x128xbf16>
    %c0_3 = arith.constant 0 : index
    %c0_4 = arith.constant 0 : index
    %4 = vector.load %arg3[%c0_3, %c0_4] : memref<256x128xbf16, #tpu.memory_space<vmem>>, vector<256x128xbf16>
    tpu.vector_store %arg3[%c0_3, %c0_4], %3 {strides = array<i32>} : memref<256x128xbf16, #tpu.memory_space<vmem>>, vector<256x128xbf16>,
    return
  }
  func.func @transform_0(%arg0: i32) -> (i32, i32) {
    %c0_i32 = arith.constant 0 : i32
    %c0_i32_0 = arith.constant 0 : i32
    return %arg0, %c0_i32 : i32, i32
  }
  func.func @transform_1(%arg0: i32) -> (i32, i32) {
    %c0_i32 = arith.constant 0 : i32
    %c0_i32_0 = arith.constant 0 : i32
    %c0_i32_1 = arith.constant 0 : i32
    return %c0_i32, %c0_i32_0 : i32, i32
  }
  func.func @transform_2(%arg0: i32) -> (i32, i32) {
    %c0_i32 = arith.constant 0 : i32
    %c0_i32_0 = arith.constant 0 : i32
    return %arg0, %c0_i32 : i32, i32
  }
}

</mosaic_0001>

<bundles_post_ra>
// kernel: tpu_custom_call.1
= control target key start
LH: loop header
LB: loop body
LE: loop exit
PB: predicated region body
PF: predicated region fallthrough
CT: control target
= control target key end

     0   :  { %vm157_vm0 = vcmask 523264   ;;  %s959_s0 = inlined_call_operand.vmem [shape: bf16[256,64], index: 0, kind: input, shape index: {}]   ;;  %s960_s1 = inlined_call_operand.vmem [shape: bf16[64,128], index: 1, kind: input, shape index: {}]   ;;  %s961_s2 = inlined_call_operand.hbm [shape: bf16[256,128], index: 2, kind: output, shape index: {}]  }
   0x1   :  { %v809_v0 = vld [vmem:[%s960_s1] sm:$0xff]   ;;  %v810_v1 = vld [vmem:[%s960_s1 + $0x8] sm:$0xff]   ;;  %v811_v2 = vld [vmem:[%s960_s1 + $0x10] sm:$0xff]  }
   0x2   :  { %758 = vmatprep.subr.bf16.mxu0 %v809_v0  ;;  %798 = vmatprep.subr.bf16.mxu1 %v809_v0  ;;  %v813_v3 = vld [vmem:[%s959_s0] sm:$0xff]   ;;  %v812_v5 = vld [vmem:[%s960_s1 + $0x18] sm:$0xff]   ;;  %v815_v6 = vld [vmem:[%s959_s0 + $0x8] sm:$0xff]  }
   0x3   :  { %759 = vmatpush3.bf16.msra.mxu0 %v809_v0  ;;  %802 = vmatpush3.bf16.msra.mxu1 %v809_v0  ;;  %v814_v4 = vld [vmem:[%s959_s0 + $0x40] sm:$0xff]   ;;  %v816_v7 = vld [vmem:[%s959_s0 + $0x48] sm:$0xff]   ;;  %v817_v8 = vld [vmem:[%s959_s0 + $0x10] sm:$0xff]  }
   0x4   :  { %760 = vmatprep.subr.bf16.mxu0 %v810_v1  ;;  %799 = vmatprep.subr.bf16.mxu1 %v810_v1  ;;  %v818_v9 = vld [vmem:[%s959_s0 + $0x50] sm:$0xff]  }
   0x5   :  { %766 = vmatprep.mubr.msk.bf16.mxu0 %vm157_vm0, %v813_v3  ;;  %782 = vmatprep.mubr.msk.bf16.mxu1 %vm157_vm0, %v814_v4 }
   0x7   :  { %761 = vmatpush3.bf16.msra.mxu0 %v810_v1  ;;  %803 = vmatpush3.bf16.msra.mxu1 %v810_v1 }
   0x8   :  { %762 = vmatprep.subr.bf16.mxu0 %v811_v2  ;;  %800 = vmatprep.subr.bf16.mxu1 %v811_v2 }
   0xb   :  { %763 = vmatpush3.bf16.msra.mxu0 %v811_v2  ;;  %804 = vmatpush3.bf16.msra.mxu1 %v811_v2 }
   0xc   :  { %764 = vmatprep.subr.bf16.mxu0 %v812_v5  ;;  %801 = vmatprep.subr.bf16.mxu1 %v812_v5 }
   0xf   :  { %765 = vmatpush3.bf16.msra.mxu0 %v812_v5  ;;  %805 = vmatpush3.bf16.msra.mxu1 %v812_v5 }
  0x12   :  { %767 = vmatmul.mubr.msk.bf16.vlgmr.msra.gmra.mrb[0].mxu0 %vm157_vm0, %v815_v6  ;;  %783 = vmatmul.mubr.msk.bf16.vlgmr.msra.gmra.mrb[0].mxu1 %vm157_vm0, %v816_v7 }
  0x13   :  { %770 = vmatprep.mubr.msk.bf16.mxu0 %vm157_vm0, %v817_v8  ;;  %786 = vmatprep.mubr.msk.bf16.mxu1 %vm157_vm0, %v818_v9 }
  0x14   :  { %7 = vsyncpa [#allocation3], 0  ;;  %v819_v10 = vld [vmem:[%s959_s0 + $0x18] sm:$0xff]   ;;  %v821_v12 = vld [vmem:[%s959_s0 + $0x20] sm:$0xff]  }
  0x15   :  { %v820_v11 = vld [vmem:[%s959_s0 + $0x58] sm:$0xff]   ;;  %v822_v13 = vld [vmem:[%s959_s0 + $0x60] sm:$0xff]   ;;  %v823_v14 = vld [vmem:[%s959_s0 + $0x28] sm:$0xff]  }
  0x16   :  { %v824_v15 = vld [vmem:[%s959_s0 + $0x68] sm:$0xff]   ;;  %v825_v16 = vld [vmem:[%s959_s0 + $0x30] sm:$0xff]   ;;  %v827_v18 = vld [vmem:[%s959_s0 + $0x38] sm:$0xff]  }
  0x17   :  { %v826_v17 = vld [vmem:[%s959_s0 + $0x70] sm:$0xff]   ;;  %v828_v19 = vld [vmem:[%s959_s0 + $0x78] sm:$0xff]   ;;  %s853_s0 = smov [#allocation2]  }
  0x18   :  { %s532_s20 = sshll.u32 %s853_s0, 4  ;;  %s533_s20 = int_to_ptr.vmem [resolvable:$true] %s532_s20 }
  0x19   :  { %s829_s21 = scalar_lea.vmem %s533_s20, 2048  ;;  %p834_p1 = scmp.lt.s32.totalorder %s533_s20, %s533_s20 }
  0x1a   :  { %771 = vmatmul.mubr.msk.bf16.gmra.mrb[4].mxu0 %vm157_vm0, %v819_v10  ;;  %787 = vmatmul.mubr.msk.bf16.gmra.mrb[4].mxu1 %vm157_vm0, %v820_v11  ;;  %p830_p0 = scmp.ne.s32.totalorder %s533_s20, %s829_s21  ;;  %p835_p2 = scmp.lt.s32.totalorder %s829_s21, %s829_s21 }
  0x1b   :  { %774 = vmatprep.mubr.msk.bf16.mxu0 %vm157_vm0, %v821_v12  ;;  %790 = vmatprep.mubr.msk.bf16.mxu1 %vm157_vm0, %v822_v13 }
  0x1c   :  { %p836_p3 = por %p835_p2, %p834_p1 }
  0x1e   :  { %p837_p4 = pnand %p836_p3, %p830_p0 }
  0x22   :  { %775 = vmatmul.mubr.msk.bf16.gmra.mrb[8].mxu0 %vm157_vm0, %v823_v14  ;;  %791 = vmatmul.mubr.msk.bf16.gmra.mrb[8].mxu1 %vm157_vm0, %v824_v15 }
  0x23   :  { %778 = vmatprep.mubr.msk.bf16.mxu0 %vm157_vm0, %v825_v16  ;;  %794 = vmatprep.mubr.msk.bf16.mxu1 %vm157_vm0, %v826_v17 }
  0x2a   :  { %779 = vmatmul.mubr.msk.bf16.gmra.mrb[12].mxu0 %vm157_vm0, %v827_v18  ;;  %795 = vmatmul.mubr.msk.bf16.gmra.mrb[12].mxu1 %vm157_vm0, %v828_v19 }
  0xe5   :  { %v768_v20 = vpop.f32.mrb[0].mxu0  ;;  %v784_v21 = vpop.f32.mrb[0].mxu1 }
  0xe6   :  { %v240_v22 = vpop.f32.mrb[1].mxu0  ;;  %v304_v23 = vpop.f32.mrb[1].mxu1 }
  0xe7   :  { %v769_v24 = vpop.f32.mrb[2].mxu0  ;;  %v785_v25 = vpop.f32.mrb[2].mxu1 }
  0xe8   :  { %v651_v26 = vpack.c.bf16 %v769_v24, %v768_v20  ;;  %v691_v27 = vpack.c.bf16 %v785_v25, %v784_v21  ;;  %v243_v28 = vpop.f32.mrb[3].mxu0  ;;  %v307_v29 = vpop.f32.mrb[3].mxu1 }
  0xe9   :  { %v646_v30 = vpack.c.bf16 %v243_v28, %v240_v22  ;;  %v686_v31 = vpack.c.bf16 %v307_v29, %v304_v23 }
  0xea   :  { %723 = vst [vmem:[#allocation2 + $0x8] sm:$0xff] %v651_v26   ;;  %731 = vst [vmem:[#allocation2 + $0x48] sm:$0xff] %v691_v27  }
  0xeb   :  { %647 = vst [vmem:[#allocation2] sm:$0xff] %v646_v30   ;;  %730 = vst [vmem:[#allocation2 + $0x40] sm:$0xff] %v686_v31  }
  0xed   :  { %v772_v32 = vpop.f32.mrb[4].mxu0  ;;  %v788_v33 = vpop.f32.mrb[4].mxu1 }
  0xee   :  { %v256_v34 = vpop.f32.mrb[5].mxu0  ;;  %v320_v35 = vpop.f32.mrb[5].mxu1 }
  0xef   :  { %v773_v36 = vpop.f32.mrb[6].mxu0  ;;  %v789_v37 = vpop.f32.mrb[6].mxu1 }
  0xf0   :  { %v661_v38 = vpack.c.bf16 %v773_v36, %v772_v32  ;;  %v701_v39 = vpack.c.bf16 %v789_v37, %v788_v33  ;;  %v259_v40 = vpop.f32.mrb[7].mxu0  ;;  %v323_v41 = vpop.f32.mrb[7].mxu1 }
  0xf1   :  { %v656_v42 = vpack.c.bf16 %v259_v40, %v256_v34  ;;  %v696_v43 = vpack.c.bf16 %v323_v41, %v320_v35 }
  0xf2   :  { %725 = vst [vmem:[#allocation2 + $0x18] sm:$0xff] %v661_v38   ;;  %733 = vst [vmem:[#allocation2 + $0x58] sm:$0xff] %v701_v39  }
  0xf3   :  { %724 = vst [vmem:[#allocation2 + $0x10] sm:$0xff] %v656_v42   ;;  %732 = vst [vmem:[#allocation2 + $0x50] sm:$0xff] %v696_v43  }
  0xf5   :  { %v776_v44 = vpop.f32.mrb[8].mxu0  ;;  %v792_v45 = vpop.f32.mrb[8].mxu1 }
  0xf6   :  { %v272_v46 = vpop.f32.mrb[9].mxu0  ;;  %v336_v47 = vpop.f32.mrb[9].mxu1 }
  0xf7   :  { %v777_v48 = vpop.f32.mrb[10].mxu0  ;;  %v793_v49 = vpop.f32.mrb[10].mxu1 }
  0xf8   :  { %v671_v50 = vpack.c.bf16 %v777_v48, %v776_v44  ;;  %v711_v51 = vpack.c.bf16 %v793_v49, %v792_v45  ;;  %v275_v52 = vpop.f32.mrb[11].mxu0  ;;  %v339_v53 = vpop.f32.mrb[11].mxu1 }
  0xf9   :  { %v666_v54 = vpack.c.bf16 %v275_v52, %v272_v46  ;;  %v706_v55 = vpack.c.bf16 %v339_v53, %v336_v47 }
  0xfa   :  { %727 = vst [vmem:[#allocation2 + $0x28] sm:$0xff] %v671_v50   ;;  %735 = vst [vmem:[#allocation2 + $0x68] sm:$0xff] %v711_v51  }
  0xfb   :  { %726 = vst [vmem:[#allocation2 + $0x20] sm:$0xff] %v666_v54   ;;  %734 = vst [vmem:[#allocation2 + $0x60] sm:$0xff] %v706_v55  }
  0xfd   :  { %v780_v56 = vpop.f32.mrb[12].mxu0  ;;  %v796_v57 = vpop.f32.mrb[12].mxu1 }
  0xfe   :  { %v288_v58 = vpop.f32.mrb[13].mxu0  ;;  %v352_v59 = vpop.f32.mrb[13].mxu1 }
  0xff   :  { %v781_v60 = vpop.f32.mrb[14].mxu0  ;;  %v797_v61 = vpop.f32.mrb[14].mxu1 }
 0x100   :  { %v681_v62 = vpack.c.bf16 %v781_v60, %v780_v56  ;;  %v721_v63 = vpack.c.bf16 %v797_v61, %v796_v57  ;;  %v291_v0 = vpop.f32.mrb[15].mxu0  ;;  %v355_v1 = vpop.f32.mrb[15].mxu1 }
 0x101   :  { %v676_v2 = vpack.c.bf16 %v291_v0, %v288_v58  ;;  %v716_v3 = vpack.c.bf16 %v355_v1, %v352_v59 }
 0x102   :  { %729 = vst [vmem:[#allocation2 + $0x38] sm:$0xff] %v681_v62   ;;  %737 = vst [vmem:[#allocation2 + $0x78] sm:$0xff] %v721_v63  }
 0x103   :  { %728 = vst [vmem:[#allocation2 + $0x30] sm:$0xff] %v676_v2   ;;  %736 = vst [vmem:[#allocation2 + $0x70] sm:$0xff] %v716_v3  }
 0x104   :  { %840 = shalt.err (!%p837_p4)
}
 0x105   :  { %s841_s24 = scalar_lea.hbm %s961_s2, 2048 }
 0x106   :  { %p842_p5 = scmp.ne.s32.totalorder %s961_s2, %s841_s24  ;;  %p845_p6 = scmp.lt.u32.totalorder %s841_s24, %s961_s2 }
 0x108   :  { %p847_p7 = pnand %p845_p6, %p842_p5 }
 0x10a   :  { %850 = shalt.err (!%p847_p7)
}
 0x10b   :  { %s854_s28 = smov 64   ;;  %s855_s29 = smov 4  }
 0x10c   :  { %538 = dma.vmem_to_hbm [thread:$0]  %s533_s20, 2048, %s961_s2, [#allocation3], %s854_s28, %s854_s28, %s855_s29  }
 0x10d   :  { %851 = dma.done.wait [#allocation3], 2048  }
 0x10e   :  { %852 = vsyncadd [#allocation3], 4294965248 }
 0x10f   :  { %542 = vsyncpa [#allocation3], 1 }

</bundles_post_ra>
